<compile_context>
chip_gen: v7x
topology: tpu7x:2x2x1
jax: 0.10.0
libtpu: 0.0.40
codegen_flags: <defaults>
</compile_context>

<pallas_src>
import functools
import math

import jax
import jax.numpy as jnp
from jax import lax
from jax.experimental import pallas as pl
from jax.experimental.pallas import tpu as pltpu


# ------------------------------ small helpers ------------------------------ #
def _round_up(x, m):
    return (x + m - 1) // m * m


def _cdiv(a, b):
    return -(-a // b)


def _pad_cols(n):
    # lane-dense: 128 minimum; multiples of 256 for wide N (v6e/v7x MXU is 256 wide)
    return 128 if n <= 128 else _round_up(n, 256)


def _choose_tm(M):
    tm = min(512, _round_up(M, 16))          # 16-aligned for bf16 sublane packing
    if M >= 128 and _cdiv(M, tm) == 1:       # ensure >=2 M blocks -> both v7x TCs busy
        tm = _round_up(_cdiv(M, 2), 16)
    return tm


def _vmem_limit(est_bytes):
    # generous 2x headroom, floor 16 MiB, cap 48 MiB (v7x physical VMEM is 64 MiB/TC)
    return int(min(max(2 * est_bytes, 16 << 20), 48 << 20))


def _mosaic_params(**kwargs):
    cls = getattr(pltpu, "CompilerParams", None) or getattr(pltpu, "TPUCompilerParams", None)
    return cls(**kwargs)


# ------------------------------ Pallas kernels ------------------------------ #
def _matmul_bias_act_kernel(p_ref, w_ref, shift_ref, o_ref, *, relu):
    """out = [relu](P @ W + shift); bf16 inputs, f32 MXU accumulation."""
    y = jnp.dot(p_ref[...], w_ref[...], preferred_element_type=jnp.float32)
    y = y + shift_ref[...]
    if relu:
        y = jnp.maximum(y, 0.0)
    o_ref[...] = y.astype(o_ref.dtype)


def _matmul_bias_act_acc_kernel(p_ref, w_ref, shift_ref, o_ref, acc_ref, *, relu):
    """Large-K fallback: acc += P @ W over the K grid axis; epilogue on the last step."""
    @pl.when(pl.program_id(1) == 0)
    def _init():
        acc_ref[...] = jnp.zeros_like(acc_ref)

    acc_ref[...] += jnp.dot(p_ref[...], w_ref[...], preferred_element_type=jnp.float32)

    @pl.when(pl.program_id(1) == pl.num_programs(1) - 1)
    def _finalize():
        y = acc_ref[...] + shift_ref[...]
        if relu:
            y = jnp.maximum(y, 0.0)
        o_ref[...] = y.astype(o_ref.dtype)


def _block_plus_proj_kernel(p_ref, w1_ref, s1_ref, w2_ref, b2_ref, o_ref):
    """Fused last stem block + final 1x1 projection: (relu(P@W1+s1)) @ W2 + b2."""
    h = jnp.dot(p_ref[...], w1_ref[...], preferred_element_type=jnp.float32)
    h = jnp.maximum(h + s1_ref[...], 0.0).astype(jnp.bfloat16)   # intermediate stays in VMEM
    y = jnp.dot(h, w2_ref[...], preferred_element_type=jnp.float32)
    o_ref[...] = (y + b2_ref[...]).astype(o_ref.dtype)


# ------------------------------ kernel wrappers ----------------------------- #
def fused_conv_matmul(patches, w_mat, shift, *, relu, out_dtype=jnp.float32):
    """Conv-as-matmul: [relu]((P @ W) + shift). BN scale is already folded into W.

    patches: (M, K) float; w_mat: (K, N) f32; shift: (N,) f32.
    """
    M, K = patches.shape
    K2, N = w_mat.shape
    assert K == K2
    N_pad = _pad_cols(N)
    tm = _choose_tm(M)
    nm = _cdiv(M, tm)                        # ragged M handled by a partial last block

    p = patches.astype(jnp.bfloat16)
    sh = shift.reshape(1, N).astype(jnp.float32)
    if N_pad != N:
        sh = jnp.pad(sh, ((0, 0), (0, N_pad - N)))

    # Keep the whole weight VMEM-resident whenever its bf16 tile is small (conv-stem
    # K = 9*Cin rarely exceeds ~2.3k, so this is always taken for the stem).
    single_k = K * N_pad * 2 <= (2 << 20)

    if single_k:
        w = w_mat.astype(jnp.bfloat16)
        if N_pad != N:
            w = jnp.pad(w, ((0, 0), (0, N_pad - N)))
        est = (2 * 2 * tm * K + 2 * 2 * K * N_pad
               + 2 * tm * N_pad * jnp.dtype(out_dtype).itemsize
               + 4 * N_pad * 4 + (2 << 20))
        out = pl.pallas_call(
            functools.partial(_matmul_bias_act_kernel, relu=relu),
            out_shape=jax.ShapeDtypeStruct((M, N_pad), out_dtype),
            grid=(nm,),
            in_specs=[
                pl.BlockSpec((tm, K), lambda m: (m, 0)),
                pl.BlockSpec((K, N_pad), lambda m: (0, 0)),      # resident weight
                pl.BlockSpec((1, N_pad), lambda m: (0, 0)),
            ],
            out_specs=pl.BlockSpec((tm, N_pad), lambda m: (m, 0)),
            compiler_params=_mosaic_params(
                dimension_semantics=("parallel",),
                vmem_limit_bytes=_vmem_limit(est),
            ),
        )(p, w, sh)
        return out[:, :N]

    # ---- large-K fallback: tiled reduction with an f32 VMEM accumulator ---------
    tk = 512
    K_pad = _round_up(K, tk)
    nk = K_pad // tk
    # K MUST be zero padded (garbage in the K tail would corrupt every output row);
    # M needs no padding (out-of-range rows only produce masked/sliced-off output).
    if K_pad != K:
        p = jnp.pad(p, ((0, 0), (0, K_pad - K)))
    w = jnp.pad(w_mat.astype(jnp.bfloat16), ((0, K_pad - K), (0, N_pad - N)))
    est = (2 * 2 * (tm * tk + tk * N_pad)
           + 2 * tm * N_pad * jnp.dtype(out_dtype).itemsize
           + tm * N_pad * 4 + 4 * N_pad * 4 + (2 << 20))
    out = pl.pallas_call(
        functools.partial(_matmul_bias_act_acc_kernel, relu=relu),
        out_shape=jax.ShapeDtypeStruct((M, N_pad), out_dtype),
        grid=(nm, nk),
        in_specs=[
            pl.BlockSpec((tm, tk), lambda m, k: (m, k)),
            pl.BlockSpec((tk, N_pad), lambda m, k: (k, 0)),
            pl.BlockSpec((1, N_pad), lambda m, k: (0, 0)),
        ],
        out_specs=pl.BlockSpec((tm, N_pad), lambda m, k: (m, 0)),
        scratch_shapes=[pltpu.VMEM((tm, N_pad), jnp.float32)],
        compiler_params=_mosaic_params(
            dimension_semantics=("parallel", "arbitrary"),
            vmem_limit_bytes=_vmem_limit(est),
        ),
    )(p, w, sh)
    return out[:, :N]


def fused_block_proj(patches, w1, shift1, w2, bias2, *, out_dtype=jnp.float32):
    """Fused (last 3x3 block) + (final 1x1, stride 1):  (relu(P@W1+s1)) @ W2 + b2.

    The intermediate activation lives only in VMEM; its padded columns are
    relu(0 + 0) = 0 and the matching rows of W2 are 0, so the result is exact.
    """
    M, K = patches.shape
    C = w1.shape[1]
    N = w2.shape[1]
    C_pad = _pad_cols(C)
    N_pad = _pad_cols(N)
    tm = _choose_tm(M)
    nm = _cdiv(M, tm)

    p = patches.astype(jnp.bfloat16)
    w1p = jnp.pad(w1.astype(jnp.bfloat16), ((0, 0), (0, C_pad - C)))
    s1p = jnp.pad(shift1.reshape(1, C).astype(jnp.float32), ((0, 0), (0, C_pad - C)))
    w2p = jnp.pad(w2.astype(jnp.bfloat16), ((0, C_pad - C), (0, N_pad - N)))
    b2p = jnp.pad(bias2.reshape(1, N).astype(jnp.float32), ((0, 0), (0, N_pad - N)))

    est = (2 * 2 * tm * K + 2 * 2 * K * C_pad + 2 * 2 * C_pad * N_pad
           + 2 * tm * N_pad * jnp.dtype(out_dtype).itemsize
           + tm * C_pad * 4 + 4 * (C_pad + N_pad) * 4 + (2 << 20))
    out = pl.pallas_call(
        _block_plus_proj_kernel,
        out_shape=jax.ShapeDtypeStruct((M, N_pad), out_dtype),
        grid=(nm,),
        in_specs=[
            pl.BlockSpec((tm, K), lambda m: (m, 0)),
            pl.BlockSpec((K, C_pad), lambda m: (0, 0)),
            pl.BlockSpec((1, C_pad), lambda m: (0, 0)),
            pl.BlockSpec((C_pad, N_pad), lambda m: (0, 0)),
            pl.BlockSpec((1, N_pad), lambda m: (0, 0)),
        ],
        out_specs=pl.BlockSpec((tm, N_pad), lambda m: (m, 0)),
        compiler_params=_mosaic_params(
            dimension_semantics=("parallel",),
            vmem_limit_bytes=_vmem_limit(est),
        ),
    )(p, w1p, s1p, w2p, b2p)
    return out[:, :N]


# ------------------------------ glue (JAX) -------------------------------- #
def im2col(x_nhwc, ksize, stride, pad):
    """Extract conv patches -> (B*Ho*Wo, ksize*ksize*C), rows ordered (b, h, w)."""
    B, H, W, C = x_nhwc.shape
    if ksize == 1 and pad == 0:
        if stride != 1:
            x_nhwc = x_nhwc[:, ::stride, ::stride, :]
        _, Ho, Wo, _ = x_nhwc.shape
        return x_nhwc.reshape(B * Ho * Wo, C), Ho, Wo
    xp = jnp.pad(x_nhwc, ((0, 0), (pad, pad), (pad, pad), (0, 0)))
    Ho = (H + 2 * pad - ksize) // stride + 1
    Wo = (W + 2 * pad - ksize) // stride + 1
    cols = []
    for kh in range(ksize):
        for kw in range(ksize):
            cols.append(
                lax.slice(
                    xp,
                    (0, kh, kw, 0),
                    (B, kh + (Ho - 1) * stride + 1, kw + (Wo - 1) * stride + 1, C),
                    (1, stride, stride, 1),
                )
            )
    p = jnp.stack(cols, axis=3)  # (B, Ho, Wo, ksize*ksize, C)
    return p.reshape(B * Ho * Wo, ksize * ksize * C), Ho, Wo


def _torch_weight_to_mat(w):
    """(Cout, Cin, kh, kw) -> ((kh*kw*Cin), Cout), matching the im2col column order."""
    cout = w.shape[0]
    return jnp.transpose(w, (2, 3, 1, 0)).reshape(-1, cout)


def init_params(key, channels, in_chans):
    """Deterministic synthetic parameters matching the PyTorch module's shapes."""
    chans = [in_chans] + list(channels)
    n3 = len(chans) - 2
    keys = jax.random.split(key, 5 * n3 + 2)
    params = []
    k = 0
    for i in range(n3):
        cin, cout = chans[i], chans[i + 1]
        params.append(
            dict(
                w=0.2 * jax.random.normal(keys[k], (cout, cin, 3, 3), jnp.float32),
                gamma=1.0 + 0.1 * jax.random.normal(keys[k + 1], (cout,), jnp.float32),
                beta=0.1 * jax.random.normal(keys[k + 2], (cout,), jnp.float32),
                mean=0.1 * jax.random.normal(keys[k + 3], (cout,), jnp.float32),
                var=jnp.abs(1.0 + 0.1 * jax.random.normal(keys[k + 4], (cout,), jnp.float32)),
            )
        )
        k += 5
    cin, cout = chans[-2], chans[-1]
    params.append(
        dict(
            w=0.2 * jax.random.normal(keys[k], (cout, cin, 1, 1), jnp.float32),
            b=0.1 * jax.random.normal(keys[k + 1], (cout,), jnp.float32),
        )
    )
    return params


def conv_embed_forward(x_nchw, params, strides):
    """ConvEmbed forward: stem conv blocks + final 1x1 conv, then flatten(2).transpose(1,2)."""
    eps = 1e-5
    x = jnp.transpose(x_nchw, (0, 2, 3, 1)).astype(jnp.bfloat16)   # NCHW -> NHWC, bf16
    B = x.shape[0]
    n_blocks = len(params) - 1
    final = params[-1]
    w_final = _torch_weight_to_mat(final["w"])
    # The final 1x1, stride-1 projection shares its rows with the last 3x3 block,
    # so it is fused into that block's kernel (no intermediate HBM round trip).
    fuse_final = (n_blocks >= 1 and final["w"].shape[2] == 1 and strides[-1] == 1)

    for i in range(n_blocks):  # Conv3x3(no bias) + BN + ReLU
        p = params[i]
        cout = p["w"].shape[0]
        scale = p["gamma"] / jnp.sqrt(p["var"] + eps)
        shift = p["beta"] - p["mean"] * scale
        w_mat = _torch_weight_to_mat(p["w"]) * scale[None, :]       # fold BN scale into W
        patches, Ho, Wo = im2col(x, 3, strides[i], 1)
        if fuse_final and i == n_blocks - 1:
            y = fused_block_proj(patches, w_mat, shift, w_final, final["b"],
                                 out_dtype=jnp.float32)
            return y.reshape(B, Ho * Wo, w_final.shape[1])
        y = fused_conv_matmul(patches, w_mat, shift, relu=True, out_dtype=jnp.bfloat16)
        x = y.reshape(B, Ho, Wo, cout)

    # Non-fused fallback (e.g. strides[-1] != 1): final 1x1 with bias, f32 output.
    patches, Ho, Wo = im2col(x, final["w"].shape[2], strides[-1], 0)
    y = fused_conv_matmul(patches, w_final, final["b"], relu=False, out_dtype=jnp.float32)
    return y.reshape(B, Ho * Wo, w_final.shape[1])


# --------------------------- references (JAX) ------------------------------ #
def reference_forward_bf16(x_nchw, params, strides):
    """XLA reference mirroring the kernel's bf16-in / f32-accumulate / bf16-activation plan."""
    eps = 1e-5
    x = x_nchw
    n_blocks = len(params) - 1
    for i in range(n_blocks):
        p = params[i]
        scale = p["gamma"] / jnp.sqrt(p["var"] + eps)
        shift = p["beta"] - p["mean"] * scale
        w = (p["w"] * scale[:, None, None, None]).astype(jnp.bfloat16)
        y = lax.conv_general_dilated(
            x.astype(jnp.bfloat16), w, (strides[i], strides[i]), [(1, 1), (1, 1)],
            dimension_numbers=("NCHW", "OIHW", "NCHW"),
            preferred_element_type=jnp.float32,
        )
        x = jnp.maximum(y + shift[None, :, None, None], 0.0)
        x = x.astype(jnp.bfloat16).astype(jnp.float32)  # kernel keeps bf16 intermediates
    p = params[-1]
    y = lax.conv_general_dilated(
        x.astype(jnp.bfloat16), p["w"].astype(jnp.bfloat16),
        (strides[-1], strides[-1]), [(0, 0), (0, 0)],
        dimension_numbers=("NCHW", "OIHW", "NCHW"),
        preferred_element_type=jnp.float32,
    )
    y = y + p["b"][None, :, None, None]
    B, C, H, W = y.shape
    return jnp.transpose(y.reshape(B, C, H * W), (0, 2, 1))


def reference_forward_f32(x_nchw, params, strides):
    """Pure f32 reference of the original module semantics (loose sanity check)."""
    eps = 1e-5
    x = x_nchw
    n_blocks = len(params) - 1
    for i in range(n_blocks):
        p = params[i]
        x = lax.conv_general_dilated(
            x, p["w"], (strides[i], strides[i]), [(1, 1), (1, 1)],
            dimension_numbers=("NCHW", "OIHW", "NCHW"),
            precision=lax.Precision.HIGHEST,
        )
        scale = p["gamma"] / jnp.sqrt(p["var"] + eps)
        shift = p["beta"] - p["mean"] * scale
        x = jnp.maximum(x * scale[None, :, None, None] + shift[None, :, None, None], 0.0)
    p = params[-1]
    x = lax.conv_general_dilated(
        x, p["w"], (strides[-1], strides[-1]), [(0, 0), (0, 0)],
        dimension_numbers=("NCHW", "OIHW", "NCHW"),
        precision=lax.Precision.HIGHEST,
    )
    x = x + p["b"][None, :, None, None]
    B, C, H, W = x.shape
    return jnp.transpose(x.reshape(B, C, H * W), (0, 2, 1))


# ----------------------------------- main ---------------------------------- #
if __name__ == "__main__":
    # ConvEmbed(channels=[8, 16, 32], strides=[2, 2, 1], img_size=(16, 16), in_chans=4)
    channels = [8, 16, 32]
    strides = (2, 2, 1)
    in_chans = 4
    img_size = (16, 16)
    B = 2

    x = jax.random.normal(jax.random.PRNGKey(0), (B, in_chans, img_size[0], img_size[1]),
                          dtype=jnp.float32)
    params = init_params(jax.random.PRNGKey(42), channels, in_chans)

    # 1) Direct kernel check exercising the single-K fast path, the lane-dense N
    #    padding (48 -> 128), and the ragged-M cdiv grid (M=200 -> two blocks, the
    #    second one partial and masked on store).
    a = jax.random.normal(jax.random.PRNGKey(1), (200, 72), jnp.float32)
    bm = 0.1 * jax.random.normal(jax.random.PRNGKey(2), (72, 48), jnp.float32)
    bias = jax.random.normal(jax.random.PRNGKey(3), (48,), jnp.float32)
    got = jax.block_until_ready(fused_conv_matmul(a, bm, bias, relu=True, out_dtype=jnp.float32))
    want = jnp.maximum(
        jnp.dot(a.astype(jnp.bfloat16), bm.astype(jnp.bfloat16),
                preferred_element_type=jnp.float32) + bias[None, :], 0.0)
    assert got.shape == want.shape, got.shape
    assert jnp.allclose(got, want, atol=2e-3, rtol=2e-3), float(jnp.max(jnp.abs(got - want)))

    # 2) Full ConvEmbed forward (jit'ed so host-side patch prep overlaps the kernels).
    forward = jax.jit(conv_embed_forward, static_argnums=2)
    out = jax.block_until_ready(forward(x, params, strides))

    stride_prod = math.prod(strides)
    num_patches = (img_size[0] // stride_prod) ** 2
    assert out.shape == (B, num_patches, channels[-1]), out.shape

    # Tight check against a reference that mirrors the bf16-in / f32-acc strategy.
    ref_mirror = reference_forward_bf16(x, params, strides)
    assert jnp.allclose(out, ref_mirror, atol=1e-2, rtol=1e-2), \
        float(jnp.max(jnp.abs(out - ref_mirror)))

    # Loose sanity check against the pure f32 reference of the original module.
    ref_f32 = reference_forward_f32(x, params, strides)
    assert jnp.allclose(out, ref_f32, atol=2e-1, rtol=1e-1), \
        float(jnp.max(jnp.abs(out - ref_f32)))

    print("KERNEL_OK")
</pallas_src>

<mosaic_0001>
module attributes {stable_mosaic.version = 11 : i64} {
  func.func @_matmul_bias_act_kernel(%arg0: i32, %arg1: memref<112x72xbf16, #tpu.memory_space<vmem>>, %arg2: memref<72x128xbf16, #tpu.memory_space<vmem>>, %arg3: memref<1x128xf32, #tpu.memory_space<vmem>>, %arg4: memref<112x128xf32, #tpu.memory_space<vmem>>) attributes {dimension_semantics = [#tpu.dimension_semantics<parallel>], iteration_bounds = array<i64: 2>, scalar_prefetch = 0 : i64, scratch_operands = 0 : i64, tpu.core_type = #tpu.core_type<tc>, window_params = [{transform_indices = @transform_0, window_bounds = array<i64: 112, 72>}, {pipeline_mode = #tpu.pipeline_mode<synchronous>, transform_indices = @transform_1, window_bounds = array<i64: 72, 128>}, {pipeline_mode = #tpu.pipeline_mode<synchronous>, transform_indices = @transform_2, window_bounds = array<i64: 1, 128>}, {transform_indices = @transform_3, window_bounds = array<i64: 112, 128>}]} {
    %c0 = arith.constant 0 : index
    %c0_0 = arith.constant 0 : index
    %0 = vector.load %arg1[%c0, %c0_0] : memref<112x72xbf16, #tpu.memory_space<vmem>>, vector<112x72xbf16>
    %c0_1 = arith.constant 0 : index
    %c0_2 = arith.constant 0 : index
    %1 = vector.load %arg2[%c0_1, %c0_2] : memref<72x128xbf16, #tpu.memory_space<vmem>>, vector<72x128xbf16>
    %cst = arith.constant dense<0.000000e+00> : vector<112x128xf32>
    %2 = tpu.matmul %0, %1, %cst {dimension_numbers = #tpu.dot_dimension_numbers<[1], [0], [0], [1], [0, 0, 1, 1], [], []>} : vector<112x72xbf16>, vector<72x128xbf16>, vector<112x128xf32> -> vector<112x128xf32>
    %c0_3 = arith.constant 0 : index
    %c0_4 = arith.constant 0 : index
    %3 = vector.load %arg3[%c0_3, %c0_4] : memref<1x128xf32, #tpu.memory_space<vmem>>, vector<1x128xf32>
    %4 = vector.broadcast %3 : vector<1x128xf32> to vector<112x128xf32>
    %5 = arith.addf %2, %4 : vector<112x128xf32>
    %cst_5 = arith.constant 0.000000e+00 : f32
    %6 = vector.broadcast %cst_5 : f32 to vector<112x128xf32>
    %7 = arith.maximumf %5, %6 : vector<112x128xf32>
    %c0_6 = arith.constant 0 : index
    %c0_7 = arith.constant 0 : index
    %8 = vector.load %arg4[%c0_6, %c0_7] : memref<112x128xf32, #tpu.memory_space<vmem>>, vector<112x128xf32>
    tpu.vector_store %arg4[%c0_6, %c0_7], %7 {strides = array<i32>} : memref<112x128xf32, #tpu.memory_space<vmem>>, vector<112x128xf32>,
    return
  }
  func.func @transform_0(%arg0: i32) -> (i32, i32) {
    %c0_i32 = arith.constant 0 : i32
    %c0_i32_0 = arith.constant 0 : i32
    return %arg0, %c0_i32 : i32, i32
  }
  func.func @transform_1(%arg0: i32) -> (i32, i32) {
    %c0_i32 = arith.constant 0 : i32
    %c0_i32_0 = arith.constant 0 : i32
    %c0_i32_1 = arith.constant 0 : i32
    return %c0_i32, %c0_i32_0 : i32, i32
  }
  func.func @transform_2(%arg0: i32) -> (i32, i32) {
    %c0_i32 = arith.constant 0 : i32
    %c0_i32_0 = arith.constant 0 : i32
    %c0_i32_1 = arith.constant 0 : i32
    return %c0_i32, %c0_i32_0 : i32, i32
  }
  func.func @transform_3(%arg0: i32) -> (i32, i32) {
    %c0_i32 = arith.constant 0 : i32
    %c0_i32_0 = arith.constant 0 : i32
    return %arg0, %c0_i32 : i32, i32
  }
}

</mosaic_0001>

<bundles_post_ra>
// kernel: tpu_custom_call.1
= control target key start
LH: loop header
LB: loop body
LE: loop exit
PB: predicated region body
PF: predicated region fallthrough
CT: control target
= control target key end

     0   :  { %8 = vsyncpa [#allocation3], 0  ;;  %s937_s0 = inlined_call_operand.vmem [shape: bf16[200,72], index: 0, kind: input, shape index: {}]   ;;  %s938_s1 = inlined_call_operand.vmem [shape: bf16[72,128], index: 1, kind: input, shape index: {}]   ;;  %s939_s2 = inlined_call_operand.vmem [shape: f32[1,128], index: 2, kind: input, shape index: {}]   ;;  %s940_s3 = inlined_call_operand.hbm [shape: f32[200,128], index: 3, kind: output, shape index: {}]  }
   0x1   :  { %10 = vsyncpa [#allocation3 + $0x1], 0  ;;  %s751_s12 = smov 0   ;;  %s753_s13 = smov 0  }
   0x2   :  { %s755_s14 = smov 0   ;;  %s757_s15 = smov 0  }
   0x3 LB: > { %s772_s16 = sadd.s32 4294967295, %s724_s15   ;;  %s514_s17 = sadd.s32 4294967294, %s724_s15   ;;  %s724_s15 = sphi %s757_s15, %s946_s15   ;;  %s720_s14 = sphi %s755_s14, %s945_s14   ;;  %s716_s13 = sphi %s753_s13, %s944_s13   ;;  %s712_s12 = sphi %s751_s12, %s943_s12  }
   0x4   : > { %s776_s18 = sadd.s32 1, %s724_s15   ;;  %s91_s19 = sadd.s32 1, %s720_s14 }
   0x5   : > { %s88_s20 = ssub.s32 %s724_s15, %s776_s18  ;;  %p101_p0 = scmp.ne.s32.totalorder %s720_s14, %s716_s13 }
   0x6   : > { %p89_p1 = scmp.eq.s32.totalorder %s88_s20, 0  ;;  %p102_p2 = scmp.eq.s32.totalorder %s772_s16, 1 }
   0x7   : > { %p107_p3 = scmp.ne.s32.totalorder %s716_s13, %s712_s12  ;;  %p108_p4 = scmp.eq.s32.totalorder %s514_s17, 1 }
   0x8   : > { %s787_s21 = scalar_select %p89_p1, %s720_s14, %s91_s19  }
   0x9   : > { %p789_p5 = por %p102_p2, %p101_p0  ;;  %p793_p6 = por %p108_p4, %p107_p3 }
   0xa   : > { %p517_p7 = scmp.ge.s32.totalorder %s724_s15, 1  ;;  %p149_p8 = scmp.lt.s32.totalorder %s724_s15, 3 }
   0xc   : > { %p150_p9 = pnand %p517_p7, %p149_p8 }
   0xd   : > { %v650_v0 = vld [vmem:[%s938_s1] sm:$0xff] (!%p150_p9)   ;;  %v726_v1 = vmov (!%p150_p9), 0.0   ;;  %v651_v2 = vld [vmem:[%s938_s1 + $0x8] sm:$0xff] (!%p150_p9)   ;;  %s806_s28 = smul.u32 (!%p150_p9), 14, %s772_s16  ;;  %vm727_vm0 = vmmov (!%p150_p9), 0   ;;  %v652_v3 = vld [vmem:[%s938_s1 + $0x10] sm:$0xff] (!%p150_p9)  }
   0xe   : > { %153 = sbr.rel (%p150_p9) target bundleno = 305 (0x131), region = 32  ;;  %559 = vmatprep.subr.bf16.mxu0 (!%p150_p9), %v726_v1  ;;  %597 = vmatprep.subr.bf16.mxu1 (!%p150_p9), %v726_v1  ;;  %v653_v4 = vld [vmem:[%s938_s1 + $0x18] sm:$0xff] (!%p150_p9)   ;;  %v654_v5 = vld [vmem:[%s938_s1 + $0x20] ss:$0 sps:$4 sm:$0xff] (!%p150_p9)   ;;  %vm311_vm1 = vcmask (!%p150_p9), 1043456   ;;  %vm289_vm2 = vcmask (!%p150_p9), 588800  }
   0xf   : > { %560 = vmatpush3.bf16.msra.mxu0 (!%p150_p9), %v650_v0  ;;  %602 = vmatpush3.bf16.msra.mxu1 (!%p150_p9), %v650_v0  ;;  %p182_p10 = scmp.lt.s32.totalorder (!%p150_p9), %s806_s28, 24  ;;  %v313_v6 = vsel (!%p150_p9), %vm311_vm1, %v654_v5, 0  ;;  %s174_s19 = sand.u32 (!%p150_p9), 1, %s716_s13   ;;  %v842_v14 = vld [vmem:[%s939_s2] ss:$0 sm:$0xff] (!%p150_p9) }
  0x10   : > { %561 = vmatprep.subr.bf16.mxu0 (!%p150_p9), %v726_v1  ;;  %598 = vmatprep.subr.bf16.mxu1 (!%p150_p9), %v726_v1  ;;  %s607_s20 = smul.u32 (!%p150_p9), 112, %s174_s19  ;;  %s876_s27 = scalar_lea.sflag (!%p150_p9), [#allocation3], %s174_s19 }
  0x11   : > { %569 = vmatprep.mubr.msk.bf16.mxu0 (!%p150_p9), %vm727_vm0, %v726_v1  ;;  %585 = vmatprep.mubr.msk.bf16.mxu1 (!%p150_p9), %vm727_vm0, %v726_v1 }
  0x12   : > { %s848_s26 = scalar_lea.vmem (!%p150_p9), [#allocation2], %s607_s20 }
  0x13   : > { %562 = vmatpush3.bf16.msra.mxu0 (!%p150_p9), %v651_v2  ;;  %603 = vmatpush3.bf16.msra.mxu1 (!%p150_p9), %v651_v2 }
  0x14   : > { %563 = vmatprep.subr.bf16.mxu0 (!%p150_p9), %v726_v1  ;;  %599 = vmatprep.subr.bf16.mxu1 (!%p150_p9), %v726_v1 }
  0x15   : > { %s183_s4 = scalar_select %p182_p10, %s806_s28, 24 }
  0x16   : > { %s441_s29 = ssub.s32 (%p789_p5), 25, %s806_s28 }
  0x17   : > { %s518_s5 = sshll.u32 %s183_s4, 2  ;;  %564 = vmatpush3.bf16.msra.mxu0 %v652_v3  ;;  %604 = vmatpush3.bf16.msra.mxu1 %v652_v3  ;;  %p442_p11 = scmp.lt.s32.totalorder (%p789_p5), %s441_s29, 14 }
  0x18   : > { %s185_s10 = scalar_lea.vmem %s937_s0, %s518_s5  ;;  %565 = vmatprep.subr.bf16.mxu0 %v726_v1  ;;  %600 = vmatprep.subr.bf16.mxu1 %v726_v1 }
  0x19   : > { %v655_v7 = vld [vmem:[%s185_s10] sm:$0xff]   ;;  %v657_v9 = vld [vmem:[%s185_s10 + $0x8] sm:$0xff]   ;;  %v659_v11 = vld [vmem:[%s185_s10 + $0x10] sm:$0xff]  }
  0x1a   : > { %v656_v8 = vld [vmem:[%s185_s10 + $0x20] sm:$0xff]   ;;  %v658_v10 = vld [vmem:[%s185_s10 + $0x28] sm:$0xff]   ;;  %v660_v12 = vld [vmem:[%s185_s10 + $0x30] sm:$0xff]  }
  0x1b   : > { %566 = vmatpush3.bf16.msra.mxu0 %v653_v4  ;;  %605 = vmatpush3.bf16.msra.mxu1 %v653_v4  ;;  %v661_v13 = vld [vmem:[%s185_s10 + $0x18] sm:$0xff]  }
  0x1c   : > { %567 = vmatprep.subr.bf16.mxu0 %v726_v1  ;;  %601 = vmatprep.subr.bf16.mxu1 %v726_v1 }
  0x1f   : > { %568 = vmatpush3.bf16.msra.mxu0 %v313_v6  ;;  %606 = vmatpush3.bf16.msra.mxu1 %v313_v6 }
  0x22   : > { %570 = vmatmul.mubr.msk.bf16.vlgmr.msra.gmra.mrb[0].mxu0 %vm289_vm2, %v655_v7  ;;  %586 = vmatmul.mubr.msk.bf16.vlgmr.msra.gmra.mrb[0].mxu1 %vm289_vm2, %v656_v8 }
  0x23   : > { %573 = vmatprep.mubr.msk.bf16.mxu0 %vm727_vm0, %v726_v1  ;;  %589 = vmatprep.mubr.msk.bf16.mxu1 %vm727_vm0, %v726_v1 }
  0x2a   : > { %574 = vmatmul.mubr.msk.bf16.gmra.mrb[4].mxu0 %vm289_vm2, %v657_v9  ;;  %590 = vmatmul.mubr.msk.bf16.gmra.mrb[4].mxu1 %vm289_vm2, %v658_v10 }
  0x2b   : > { %577 = vmatprep.mubr.msk.bf16.mxu0 %vm727_vm0, %v726_v1  ;;  %593 = vmatprep.mubr.msk.bf16.mxu1 %vm727_vm0, %v726_v1 }
  0x32   : > { %578 = vmatmul.mubr.msk.bf16.gmra.mrb[8].mxu0 %vm289_vm2, %v659_v11  ;;  %594 = vmatmul.mubr.msk.bf16.gmra.mrb[8].mxu1 %vm289_vm2, %v660_v12 }
  0x33   : > { %581 = vmatprep.mubr.msk.bf16.mxu0 %vm727_vm0, %v726_v1 }
  0x3a   : > { %582 = vmatmul.mubr.msk.bf16.gmra.mrb[12].mxu0 %vm289_vm2, %v661_v13 }
  0xf5   : > { %v349_v15 = vpop.f32.mrb[0].mxu0  ;;  %v381_v16 = vpop.f32.mrb[0].mxu1 }
  0xf6   : > { %v350_v17 = vadd.f32 %v842_v14, %v349_v15  ;;  %v571_v18 = vpop.f32.mrb[1].mxu0  ;;  %v382_v19 = vadd.f32 %v842_v14, %v381_v16  ;;  %v587_v20 = vpop.f32.mrb[1].mxu1 }
  0xf7   : > { %v352_v21 = vpop.f32.mrb[2].mxu0  ;;  %v384_v22 = vpop.f32.mrb[2].mxu1 }
  0xf8   : > { %v404_v23 = vmax.f32 %v350_v17, 0.0  ;;  %v353_v24 = vadd.f32 %v842_v14, %v352_v21  ;;  %v572_v25 = vpop.f32.mrb[3].mxu0  ;;  %v412_v26 = vmax.f32 %v382_v19, 0.0  ;;  %v385_v27 = vadd.f32 %v842_v14, %v384_v22  ;;  %v588_v28 = vpop.f32.mrb[3].mxu1 }
  0xfa   : > { %418 = vst [vmem:[%s848_s26] sm:$0xff] %v404_v23  ;;  %v405_v29 = vmax.f32 %v353_v24, 0.0  ;;  %426 = vst [vmem:[%s848_s26 + $0x40] sm:$0xff] %v412_v26  ;;  %v413_v30 = vmax.f32 %v385_v27, 0.0 }
  0xfc   : > { %419 = vst [vmem:[%s848_s26 + $0x8] sm:$0xff] %v405_v29  ;;  %427 = vst [vmem:[%s848_s26 + $0x48] sm:$0xff] %v413_v30 }
  0xfd   : > { %v357_v31 = vpop.f32.mrb[4].mxu0  ;;  %v389_v32 = vpop.f32.mrb[4].mxu1 }
  0xfe   : > { %v358_v33 = vadd.f32 %v842_v14, %v357_v31  ;;  %v575_v34 = vpop.f32.mrb[5].mxu0  ;;  %v390_v35 = vadd.f32 %v842_v14, %v389_v32  ;;  %v591_v36 = vpop.f32.mrb[5].mxu1 }
  0xff   : > { %v360_v37 = vpop.f32.mrb[6].mxu0  ;;  %v392_v38 = vpop.f32.mrb[6].mxu1 }
 0x100   : > { %v406_v39 = vmax.f32 %v358_v33, 0.0  ;;  %v361_v40 = vadd.f32 %v842_v14, %v360_v37  ;;  %v576_v41 = vpop.f32.mrb[7].mxu0  ;;  %v414_v42 = vmax.f32 %v390_v35, 0.0  ;;  %v393_v43 = vadd.f32 %v842_v14, %v392_v38  ;;  %v592_v44 = vpop.f32.mrb[7].mxu1 }
 0x102   : > { %420 = vst [vmem:[%s848_s26 + $0x10] sm:$0xff] %v406_v39  ;;  %v407_v45 = vmax.f32 %v361_v40, 0.0  ;;  %428 = vst [vmem:[%s848_s26 + $0x50] sm:$0xff] %v414_v42  ;;  %v415_v46 = vmax.f32 %v393_v43, 0.0 }
 0x104   : > { %421 = vst [vmem:[%s848_s26 + $0x18] sm:$0xff] %v407_v45  ;;  %429 = vst [vmem:[%s848_s26 + $0x58] sm:$0xff] %v415_v46 }
 0x105   : > { %v365_v47 = vpop.f32.mrb[8].mxu0  ;;  %v397_v48 = vpop.f32.mrb[8].mxu1 }
 0x106   : > { %v366_v49 = vadd.f32 %v842_v14, %v365_v47  ;;  %v579_v50 = vpop.f32.mrb[9].mxu0  ;;  %v398_v51 = vadd.f32 %v842_v14, %v397_v48  ;;  %v595_v52 = vpop.f32.mrb[9].mxu1 }
 0x107   : > { %v368_v53 = vpop.f32.mrb[10].mxu0  ;;  %v400_v54 = vpop.f32.mrb[10].mxu1 }
 0x108   : > { %v408_v55 = vmax.f32 %v366_v49, 0.0  ;;  %v369_v56 = vadd.f32 %v842_v14, %v368_v53  ;;  %v580_v57 = vpop.f32.mrb[11].mxu0  ;;  %v416_v58 = vmax.f32 %v398_v51, 0.0  ;;  %v401_v59 = vadd.f32 %v842_v14, %v400_v54  ;;  %v596_v60 = vpop.f32.mrb[11].mxu1 }
 0x10a   : > { %422 = vst [vmem:[%s848_s26 + $0x20] sm:$0xff] %v408_v55  ;;  %v409_v61 = vmax.f32 %v369_v56, 0.0  ;;  %430 = vst [vmem:[%s848_s26 + $0x60] sm:$0xff] %v416_v58  ;;  %v417_v62 = vmax.f32 %v401_v59, 0.0 }
 0x10c   : > { %423 = vst [vmem:[%s848_s26 + $0x28] sm:$0xff] %v409_v61  ;;  %431 = vst [vmem:[%s848_s26 + $0x68] sm:$0xff] %v417_v62 }
 0x10d   : > { %v373_v63 = vpop.f32.mrb[12].mxu0 }
 0x10e   : > { %v374_v0 = vadd.f32 %v842_v14, %v373_v63  ;;  %v583_v1 = vpop.f32.mrb[13].mxu0  ;;  %439 = sbr.rel (!%p789_p5) target bundleno = 305 (0x131), region = 36 }
 0x10f   : > { %v376_v2 = vpop.f32.mrb[14].mxu0 }
 0x110   : > { %v410_v3 = vmax.f32 %v374_v0, 0.0  ;;  %v377_v4 = vadd.f32 %v842_v14, %v376_v2  ;;  %v584_v5 = vpop.f32.mrb[15].mxu0 }
 0x112   : > { %424 = vst [vmem:[%s848_s26 + $0x30] sm:$0xff] %v410_v3  ;;  %v411_v6 = vmax.f32 %v377_v4, 0.0 }
 0x114   : > { %425 = vst [vmem:[%s848_s26 + $0x38] sm:$0xff] %v411_v6 }
 0x115   : > { %s948_s29 = smov (!%p442_p11, %s441_s29), 14 }
 0x116   : > { %s881_s30 = sshll.u32 %s948_s29, 7 }
 0x117   : > { %s446_s4 = ssub.s32 1792, %s881_s30 }
 0x118   : > { %447 = vsyncadd %s876_s27, %s446_s4  ;;  %p540_p12 = scmp.ne.s32.totalorder %s881_s30, 0  ;;  %s546_s5 = smul.u32 1792, %s772_s16 }
 0x119   : > { %s452_s6 = sshll.u32 %s848_s26, 4  ;;  %s728_s9 = smov [#allocation2]   ;;  %s893_s6 = int_to_ptr.vmem [resolvable:$true] %s452_s6 }
 0x11a   : > { %s891_s8 = scalar_lea.hbm %s940_s3, %s546_s5  ;;  %s662_s28 = scalar_lea.vmem %s893_s6, %s881_s30 }
 0x11b   : > { %p663_p13 = scmp.ne.s32.totalorder %s893_s6, %s662_s28  ;;  %s666_s10 = sshll.u32 %s728_s9, 4  ;;  %s667_s10 = int_to_ptr.vmem [resolvable:$false] %s666_s10 }
 0x11c   : > { %s668_s16 = scalar_lea.vmem %s667_s10, 3584  ;;  %p669_p2 = scmp.lt.s32.totalorder %s893_s6, %s667_s10 }
 0x11d   : > { %p664_p0 = pnand %p663_p13, %p540_p12  ;;  %p670_p3 = scmp.lt.s32.totalorder %s668_s16, %s662_s28 }
 0x11f   : > { %p665_p1 = pneg %p664_p0  ;;  %p671_p4 = por %p670_p3, %p669_p2 }
 0x121   : > { %p672_p5 = pnand %p671_p4, %p665_p1 }
 0x123   : > { %675 = shalt.err (!%p672_p5)
}
 0x124   : > { %s676_s11 = scalar_lea.hbm %s891_s8, %s881_s30  ;;  %s680_s20 = scalar_lea.hbm %s940_s3, 3200 }
 0x125   : > { %p677_p7 = scmp.ne.s32.totalorder %s891_s8, %s676_s11  ;;  %p681_p10 = scmp.lt.u32.totalorder %s891_s8, %s940_s3 }
 0x126   : > { %p682_p11 = scmp.lt.u32.totalorder %s680_s20, %s676_s11  ;;  %p684_p0 = scmp.lt.u32.totalorder %s676_s11, %s891_s8 }
 0x127   : > { %p678_p8 = pnand %p677_p7, %p540_p12 }
 0x128   : > { %p683_p13 = por %p682_p11, %p681_p10 }
 0x129   : > { %p679_p9 = pneg %p678_p8 }
 0x12a   : > { %p685_p1 = por %p684_p0, %p683_p13 }
 0x12c   : > { %p686_p2 = pnand %p685_p1, %p679_p9 }
 0x12e   : > { %689 = shalt.err (!%p686_p2)
}
 0x12f   : > { %s729_s26 = smov 128   ;;  %s730_s29 = smov 8  }
 0x130   : > { %458 = dma.vmem_to_hbm [thread:$0]  (%p540_p12), %s893_s6, %s881_s30, %s891_s8, %s876_s27, %s729_s26, %s729_s26, %s730_s29  }
 0x131 PF: > { %p613_p3 = scmp.ge.s32.totalorder %s724_s15, 2  ;;  %s467_s4 = sand.u32 1, %s712_s12  }
 0x132   : > { %s468_s5 = scalar_lea.sflag [#allocation3], %s467_s4 }
 0x133   : > { %p610_p4 = pnand %p613_p3, %p793_p6 }
 0x135   : > { %707 = dma.done.wait (!%p610_p4), %s468_s5, 1792  }
 0x136   : > { %709 = vsyncadd (!%p610_p4), %s468_s5, 4294965504  ;;  %p13_p5 = scmp.ge.s32.totalorder %s776_s18, 4   ;;  %s943_s12 = smov %s716_s13 }
 0x137   : > { %s944_s13 = smov %s720_s14  ;;  %s945_s14 = smov %s787_s21 }
 0x138   : > { %s946_s15 = smov %s776_s18  ;;  %15 = sbr.rel (!%p13_p5) target bundleno = 3 (0x3), region = 67 }
 0x13f   :  { %473 = vsyncpa [#allocation3], 1 }
 0x140   :  { %475 = vsyncpa [#allocation3 + $0x1], 1 }

</bundles_post_ra>
